<compile_context>
chip_gen: v7x
topology: tpu7x:2x2x1
jax: 0.10.0
libtpu: 0.0.40
codegen_flags: <defaults>
</compile_context>

<pallas_src>
import functools

import jax
import jax.numpy as jnp
from jax.experimental import pallas as pl
from jax.experimental.pallas import tpu as pltpu


_MiB = 1024 * 1024


def _hw_config():
    """(vmem_limit_bytes, tile_budget_bytes, num_cores) for the local TPU generation."""
    vmem_bytes = None
    try:
        info = pltpu.get_tpu_info()
        vmem_bytes = getattr(info, "vmem_capacity_bytes", None)
    except Exception:
        vmem_bytes = None
    if vmem_bytes is None:
        # Conservative defaults that are safe on every generation (incl. v7x 64 MiB/TC).
        return 32 * _MiB, 24 * _MiB, 2
    if vmem_bytes >= 96 * _MiB:
        # v5e / v6e: 128 MiB VMEM, single TensorCore per chip.
        return 100 * _MiB, 72 * _MiB, 1
    # v7x-class: 64 MiB VMEM per TensorCore, 2 TensorCores per chip.
    return 48 * _MiB, 36 * _MiB, 2


# ---------------------------------------------------------------------------
# Single-pass kernel: whole per-channel reduction extent resident per block.
# ---------------------------------------------------------------------------
def _single_pass_kernel(x_ref, o_ref, mean_ref, var_ref, *,
                        qmin, qmax, inv_step, eps_n, quantize, inv_n):
    x = x_ref[...]                                            # (N, C_TILE, HW) f32
    if quantize:
        # Grid domain: y = clip(round(x/step)); `step` folded into mean/var/eps, so the
        # per-element `* step` multiply is dropped.  Stats are emitted in grid units.
        # NOTE: jnp.round is round-half-to-even; dfxp.cu may round half away from zero
        # (at most 1 LSB difference on exact .5 boundaries).
        y = jnp.clip(jnp.round(x * inv_step), qmin, qmax)
        s1 = jnp.sum(y, axis=(0, 2), keepdims=True)           # (1, C_TILE, 1)
        s2 = jnp.sum(y * y, axis=(0, 2), keepdims=True)
        mean = s1 * inv_n
        var = jnp.maximum(s2 * inv_n - mean * mean, 0.0)
        o_ref[...] = ((y - mean) * jax.lax.rsqrt(var + eps_n)).astype(o_ref.dtype)
    else:
        # bits == 32: centered formulation to avoid cancellation on offset inputs.
        s1 = jnp.sum(x, axis=(0, 2), keepdims=True)
        mean = s1 * inv_n
        centered = x - mean
        var = jnp.sum(centered * centered, axis=(0, 2), keepdims=True) * inv_n
        o_ref[...] = (centered * jax.lax.rsqrt(var + eps_n)).astype(o_ref.dtype)

    # Lane-padded (C_TILE, 128) stats -> unmasked vector stores.
    mean_ref[...] = jnp.broadcast_to(mean[0], mean_ref.shape)
    var_ref[...] = jnp.broadcast_to(var[0], var_ref.shape)


# ---------------------------------------------------------------------------
# Two-pass fallback: pass 1 accumulates s1/s2 per channel, pass 2 normalizes.
# ---------------------------------------------------------------------------
def _stats_kernel(x_ref, mean_ref, var_ref, s1_acc, s2_acc, shift_acc, *,
                  qmin, qmax, inv_step, quantize, hw, hw_tile, inv_n):
    r = pl.program_id(1)
    last = pl.num_programs(1) - 1

    @pl.when(r == 0)
    def _():
        s1_acc[...] = jnp.zeros_like(s1_acc)
        s2_acc[...] = jnp.zeros_like(s2_acc)
        if not quantize:
            # Per-channel shift for shifted sufficient statistics (avoids catastrophic
            # cancellation of E[x^2] - E[x]^2 on offset unquantized activations).
            shift_acc[...] = x_ref[0, :, 0:1]

    x = x_ref[...]                                            # (N, C_TILE, HW_TILE)
    if quantize:
        y = jnp.clip(jnp.round(x * inv_step), qmin, qmax)     # grid domain
    else:
        y = x - shift_acc[...][None]

    if hw % hw_tile:
        # Masking only on the last (partial) HW tile; all other tiles take the cheap path.
        @pl.when(r != last)
        def _():
            s1_acc[...] += jnp.sum(y, axis=(0, 2), keepdims=True)[0]
            s2_acc[...] += jnp.sum(y * y, axis=(0, 2), keepdims=True)[0]

        @pl.when(r == last)
        def _():
            lane = jax.lax.broadcasted_iota(jnp.int32, y.shape, 2) + r * hw_tile
            ym = jnp.where(lane < hw, y, 0.0)
            s1_acc[...] += jnp.sum(ym, axis=(0, 2), keepdims=True)[0]
            s2_acc[...] += jnp.sum(ym * ym, axis=(0, 2), keepdims=True)[0]
    else:
        s1_acc[...] += jnp.sum(y, axis=(0, 2), keepdims=True)[0]
        s2_acc[...] += jnp.sum(y * y, axis=(0, 2), keepdims=True)[0]

    @pl.when(r == last)
    def _():
        mean_y = s1_acc[...] * inv_n
        var = jnp.maximum(s2_acc[...] * inv_n - mean_y * mean_y, 0.0)
        mean = mean_y if quantize else mean_y + shift_acc[...]
        mean_ref[...] = jnp.broadcast_to(mean, mean_ref.shape)
        var_ref[...] = jnp.broadcast_to(var, var_ref.shape)


def _apply_kernel(x_ref, mean_ref, var_ref, o_ref, *, qmin, qmax, inv_step, eps_n, quantize):
    x = x_ref[...]                                            # (N, C_TILE, HW_TILE)
    mean = mean_ref[:, 0:1][None]                             # (1, C_TILE, 1)
    var = var_ref[:, 0:1][None]
    if quantize:
        y = jnp.clip(jnp.round(x * inv_step), qmin, qmax)     # recompute (cheap, VPU has slack)
    else:
        y = x
    o_ref[...] = ((y - mean) * jax.lax.rsqrt(var + eps_n)).astype(o_ref.dtype)


# ---------------------------------------------------------------------------
# Tile-size selection.
# ---------------------------------------------------------------------------
def _choose_c_tile(C, N, HW, budget, quantize, num_cores):
    # Per resident channel: double-buffered in/out tiles + elementwise temporaries.
    # bits==32 keeps x and `centered` live simultaneously -> bigger factor.
    factor = 6 if quantize else 8
    per_channel_bytes = factor * N * HW * 4
    min_tile = C if C <= 8 else 8
    if per_channel_bytes * min_tile > budget:
        return None                                   # use the two-pass fallback
    if C <= 8:
        return C
    cap = max(min_tile, budget // per_channel_bytes)
    tile = min(C, cap)
    tile = max(8, (tile // 8) * 8)
    # Keep >= 2 channel-tile grid steps per TensorCore (>= 4 total on v7x) when channels allow,
    # so megacore sharding and per-core DMA/compute double-buffering both have work.
    desired = 2 * max(1, num_cores)
    while desired >= 2:
        if C >= desired * 8:
            tile = min(tile, max(8, (C // desired) // 8 * 8))
            break
        desired //= 2
    return tile


def _choose_hw_tile(N, HW, c_tile, budget, bytes_factor):
    if HW <= 128:
        return HW                                     # full extent == array dim, no masking
    per_lane_bytes = bytes_factor * N * c_tile * 4
    tile = max(1, budget // (per_lane_bytes * 128)) * 128
    max_tile = HW if HW % 128 == 0 else (HW // 128) * 128
    return max(128, min(tile, max_tile))


# ---------------------------------------------------------------------------
# pallas_call wrappers
# ---------------------------------------------------------------------------
def _single_pass(x, c_tile, *, qmin, qmax, inv_step, eps_n, quantize, vmem_limit, out_dtype):
    N, C, HW = x.shape
    kernel = functools.partial(_single_pass_kernel, qmin=qmin, qmax=qmax, inv_step=inv_step,
                               eps_n=eps_n, quantize=quantize, inv_n=1.0 / (N * HW))
    return pl.pallas_call(
        kernel,
        out_shape=(
            jax.ShapeDtypeStruct((N, C, HW), out_dtype),
            jax.ShapeDtypeStruct((C, 128), jnp.float32),
            jax.ShapeDtypeStruct((C, 128), jnp.float32),
        ),
        grid_spec=pltpu.PrefetchScalarGridSpec(
            num_scalar_prefetch=0,
            grid=(pl.cdiv(C, c_tile),),
            in_specs=[pl.BlockSpec((N, c_tile, HW), lambda i: (0, i, 0))],
            out_specs=[
                pl.BlockSpec((N, c_tile, HW), lambda i: (0, i, 0)),
                pl.BlockSpec((c_tile, 128), lambda i: (i, 0)),
                pl.BlockSpec((c_tile, 128), lambda i: (i, 0)),
            ],
        ),
        compiler_params=pltpu.CompilerParams(
            # Channel tiles are independent; "parallel" lets megacore shard them.
            # (pltpu.CORE_PARALLEL is an option when the step count is known >= num_cores.)
            dimension_semantics=("parallel",),
            vmem_limit_bytes=vmem_limit,
        ),
    )(x)


def _two_pass(x, *, qmin, qmax, inv_step, eps_n, quantize, budget, vmem_limit, out_dtype):
    N, C, HW = x.shape
    c_tile = C if C <= 8 else 8
    # Stats pass has no large output block -> ~3x per-byte factor (double-buffered input + temp);
    # apply pass streams input + output -> ~5x.
    hw_tile_stats = _choose_hw_tile(N, HW, c_tile, budget, 3)
    hw_tile_apply = _choose_hw_tile(N, HW, c_tile, budget, 5)

    stats_kernel = functools.partial(_stats_kernel, qmin=qmin, qmax=qmax, inv_step=inv_step,
                                     quantize=quantize, hw=HW, hw_tile=hw_tile_stats,
                                     inv_n=1.0 / (N * HW))
    mean_pad, var_pad = pl.pallas_call(
        stats_kernel,
        out_shape=(
            jax.ShapeDtypeStruct((C, 128), jnp.float32),
            jax.ShapeDtypeStruct((C, 128), jnp.float32),
        ),
        grid_spec=pltpu.PrefetchScalarGridSpec(
            num_scalar_prefetch=0,
            grid=(pl.cdiv(C, c_tile), pl.cdiv(HW, hw_tile_stats)),
            in_specs=[pl.BlockSpec((N, c_tile, hw_tile_stats), lambda i, r: (0, i, r))],
            out_specs=[
                pl.BlockSpec((c_tile, 128), lambda i, r: (i, 0)),
                pl.BlockSpec((c_tile, 128), lambda i, r: (i, 0)),
            ],
            scratch_shapes=[
                pltpu.VMEM((c_tile, 1), jnp.float32),   # s1
                pltpu.VMEM((c_tile, 1), jnp.float32),   # s2
                pltpu.VMEM((c_tile, 1), jnp.float32),   # shift (bits==32 path)
            ],
        ),
        compiler_params=pltpu.CompilerParams(
            dimension_semantics=("parallel", "arbitrary"),   # reduction axis last
            vmem_limit_bytes=vmem_limit,
        ),
    )(x)

    apply_kernel = functools.partial(_apply_kernel, qmin=qmin, qmax=qmax, inv_step=inv_step,
                                     eps_n=eps_n, quantize=quantize)
    out = pl.pallas_call(
        apply_kernel,
        out_shape=jax.ShapeDtypeStruct((N, C, HW), out_dtype),
        grid_spec=pltpu.PrefetchScalarGridSpec(
            num_scalar_prefetch=0,
            grid=(pl.cdiv(C, c_tile), pl.cdiv(HW, hw_tile_apply)),
            in_specs=[
                pl.BlockSpec((N, c_tile, hw_tile_apply), lambda i, r: (0, i, r)),
                pl.BlockSpec((c_tile, 128), lambda i, r: (i, 0)),
                pl.BlockSpec((c_tile, 128), lambda i, r: (i, 0)),
            ],
            out_specs=pl.BlockSpec((N, c_tile, hw_tile_apply), lambda i, r: (0, i, r)),
        ),
        compiler_params=pltpu.CompilerParams(
            dimension_semantics=("parallel", "parallel"),
            vmem_limit_bytes=vmem_limit,
        ),
    )(x, mean_pad, var_pad)
    return out, mean_pad, var_pad


def normalize2d_q(x_nchw, *, bits=8, step=2.0 ** (-5), eps=1e-5, momentum=0.1,
                  running_mean=None, running_var=None, out_dtype=jnp.float32,
                  vmem_limit_bytes=None, tile_budget_bytes=None):
    """Forward of Normalize2d_q (training mode). x_nchw: float32 (N, C, H, W)."""
    N, C, H, W = x_nchw.shape
    HW = H * W
    R = N * HW
    qmin = -(2.0 ** (bits - 1))
    qmax = 2.0 ** (bits - 1) - 1
    quantize = bits != 32
    inv_step = 1.0 / step
    # When quantizing, all arithmetic runs in the integer grid domain; eps is folded accordingly.
    eps_n = eps * inv_step * inv_step if quantize else eps

    hw_vmem, hw_budget, num_cores = _hw_config()
    if vmem_limit_bytes is None:
        vmem_limit_bytes = hw_vmem
    if tile_budget_bytes is None:
        tile_budget_bytes = hw_budget

    # Free, contiguous reshape -- no HBM transposes.
    x = x_nchw.astype(jnp.float32).reshape(N, C, HW)

    c_tile = _choose_c_tile(C, N, HW, tile_budget_bytes, quantize, num_cores)
    if c_tile is not None:
        out, mean_pad, var_pad = _single_pass(
            x, c_tile, qmin=qmin, qmax=qmax, inv_step=inv_step, eps_n=eps_n,
            quantize=quantize, vmem_limit=vmem_limit_bytes, out_dtype=out_dtype)
    else:
        out, mean_pad, var_pad = _two_pass(
            x, qmin=qmin, qmax=qmax, inv_step=inv_step, eps_n=eps_n, quantize=quantize,
            budget=tile_budget_bytes, vmem_limit=vmem_limit_bytes, out_dtype=out_dtype)

    out_nchw = out.reshape(N, C, H, W)

    # Running-stat update (glue, matches PyTorch: unbiased variance for running stats).
    # Kernel stats are in grid units when quantizing -> rescale per channel here (cheap).
    scale_m = step if quantize else 1.0
    scale_v = (step * step) if quantize else 1.0
    batch_mean = mean_pad[:, 0] * scale_m
    batch_var = var_pad[:, 0] * scale_v
    if running_mean is None:
        running_mean = jnp.zeros((C,), jnp.float32)
    if running_var is None:
        running_var = jnp.ones((C,), jnp.float32)
    unbiased_var = batch_var * (R / max(R - 1, 1))
    new_running_mean = (1.0 - momentum) * running_mean + momentum * batch_mean
    new_running_var = (1.0 - momentum) * running_var + momentum * unbiased_var

    return out_nchw, new_running_mean, new_running_var


def _reference(x_nchw, *, bits=8, step=2.0 ** (-5), eps=1e-5):
    if bits != 32:
        qmin = -(2.0 ** (bits - 1))
        qmax = 2.0 ** (bits - 1) - 1
        xq = jnp.clip(jnp.round(x_nchw / step), qmin, qmax) * step
    else:
        xq = x_nchw
    mean = jnp.mean(xq, axis=(0, 2, 3), keepdims=True)
    var = jnp.mean((xq - mean) ** 2, axis=(0, 2, 3), keepdims=True)
    return (xq - mean) / jnp.sqrt(var + eps), xq


if __name__ == "__main__":
    key = jax.random.PRNGKey(0)
    N, C, H, W = 2, 4, 16, 16
    x = jax.random.normal(key, (N, C, H, W), dtype=jnp.float32)

    # Main path: single-pass, channel-tiled kernel (generation-aware budgets).
    out, rmean, rvar = normalize2d_q(x, bits=8)
    jax.block_until_ready((out, rmean, rvar))
    ref, xq_ref = _reference(x, bits=8)
    assert out.shape == (N, C, H, W)
    assert jnp.max(jnp.abs(out - ref)) < 1e-4, "single-pass mismatch vs reference"
    # Verify grid-domain -> real-units rescaling of the batch stats via the running mean.
    ref_mean = jnp.mean(xq_ref, axis=(0, 2, 3))
    assert jnp.max(jnp.abs(rmean - 0.1 * ref_mean)) < 1e-5, "running-mean scaling mismatch"

    # Non-lane-aligned spatial extent through the single-pass path.
    x2 = jax.random.normal(jax.random.PRNGKey(1), (2, 4, 12, 12), dtype=jnp.float32)
    out2a, _, _ = normalize2d_q(x2, bits=8)
    jax.block_until_ready(out2a)
    ref2, _ = _reference(x2, bits=8)
    assert jnp.max(jnp.abs(out2a - ref2)) < 1e-4, "single-pass (144 lanes) mismatch vs reference"

    # Force the two-pass fallback (tiny tile budget) on the same non-aligned spatial size
    # to exercise the masked last-HW-tile reduction.
    out2, _, _ = normalize2d_q(x2, bits=8, tile_budget_bytes=1)
    jax.block_until_ready(out2)
    assert jnp.max(jnp.abs(out2 - ref2)) < 1e-4, "two-pass fallback mismatch vs reference"

    # bits == 32 (no quantization) identity path of the ActivationQuantizer.
    out3, _, _ = normalize2d_q(x, bits=32)
    jax.block_until_ready(out3)
    ref3, _ = _reference(x, bits=32)
    assert jnp.max(jnp.abs(out3 - ref3)) < 1e-4, "bits=32 mismatch vs reference"

    # bits == 32 through the two-pass fallback (exercises shifted sufficient statistics).
    out4, _, _ = normalize2d_q(x2, bits=32, tile_budget_bytes=1)
    jax.block_until_ready(out4)
    ref4, _ = _reference(x2, bits=32)
    assert jnp.max(jnp.abs(out4 - ref4)) < 1e-4, "bits=32 two-pass mismatch vs reference"

    print("KERNEL_OK")
</pallas_src>

<mosaic_0001>
module attributes {stable_mosaic.version = 11 : i64} {
  func.func @_single_pass_kernel(%arg0: i32, %arg1: memref<2x4x256xf32, #tpu.memory_space<vmem>>, %arg2: memref<2x4x256xf32, #tpu.memory_space<vmem>>, %arg3: memref<4x128xf32, #tpu.memory_space<vmem>>, %arg4: memref<4x128xf32, #tpu.memory_space<vmem>>) attributes {dimension_semantics = [#tpu.dimension_semantics<parallel>], iteration_bounds = array<i64: 1>, scalar_prefetch = 0 : i64, scratch_operands = 0 : i64, tpu.core_type = #tpu.core_type<tc>, window_params = [{transform_indices = @transform_0, window_bounds = array<i64: 2, 4, 256>}, {transform_indices = @transform_1, window_bounds = array<i64: 2, 4, 256>}, {transform_indices = @transform_2, window_bounds = array<i64: 4, 128>}, {transform_indices = @transform_3, window_bounds = array<i64: 4, 128>}]} {
    %c0 = arith.constant 0 : index
    %c0_0 = arith.constant 0 : index
    %c0_1 = arith.constant 0 : index
    %0 = vector.load %arg1[%c0, %c0_0, %c0_1] : memref<2x4x256xf32, #tpu.memory_space<vmem>>, vector<2x4x256xf32>
    %cst = arith.constant 3.200000e+01 : f32
    %1 = vector.broadcast %cst : f32 to vector<2x4x256xf32>
    %2 = arith.mulf %0, %1 : vector<2x4x256xf32>
    %3 = math.roundeven %2 : vector<2x4x256xf32>
    %cst_2 = arith.constant -1.280000e+02 : f32
    %cst_3 = arith.constant 1.270000e+02 : f32
    %4 = vector.broadcast %cst_2 : f32 to vector<2x4x256xf32>
    %5 = arith.maximumf %4, %3 : vector<2x4x256xf32>
    %6 = vector.broadcast %cst_3 : f32 to vector<2x4x256xf32>
    %7 = arith.minimumf %6, %5 : vector<2x4x256xf32>
    %cst_4 = arith.constant dense<0.000000e+00> : vector<4xf32>
    %8 = vector.multi_reduction <add>, %7, %cst_4 [0, 2] : vector<2x4x256xf32> to vector<4xf32>
    %9 = vector.shape_cast %8 : vector<4xf32> to vector<1x4x1xf32>
    %10 = arith.mulf %7, %7 : vector<2x4x256xf32>
    %cst_5 = arith.constant dense<0.000000e+00> : vector<4xf32>
    %11 = vector.multi_reduction <add>, %10, %cst_5 [0, 2] : vector<2x4x256xf32> to vector<4xf32>
    %12 = vector.shape_cast %11 : vector<4xf32> to vector<1x4x1xf32>
    %cst_6 = arith.constant 0.001953125 : f32
    %13 = vector.broadcast %cst_6 : f32 to vector<1x4x1xf32>
    %14 = arith.mulf %9, %13 : vector<1x4x1xf32>
    %cst_7 = arith.constant 0.001953125 : f32
    %15 = vector.broadcast %cst_7 : f32 to vector<1x4x1xf32>
    %16 = arith.mulf %12, %15 : vector<1x4x1xf32>
    %17 = arith.mulf %14, %14 : vector<1x4x1xf32>
    %18 = arith.subf %16, %17 : vector<1x4x1xf32>
    %cst_8 = arith.constant 0.000000e+00 : f32
    %19 = vector.broadcast %cst_8 : f32 to vector<1x4x1xf32>
    %20 = arith.maximumf %18, %19 : vector<1x4x1xf32>
    %21 = vector.broadcast %14 : vector<1x4x1xf32> to vector<2x4x256xf32>
    %22 = arith.subf %7, %21 : vector<2x4x256xf32>
    %cst_9 = arith.constant 1.024000e-02 : f32
    %23 = vector.broadcast %cst_9 : f32 to vector<1x4x1xf32>
    %24 = arith.addf %20, %23 : vector<1x4x1xf32>
    %25 = math.rsqrt %24 : vector<1x4x1xf32>
    %26 = vector.broadcast %25 : vector<1x4x1xf32> to vector<2x4x256xf32>
    %27 = arith.mulf %22, %26 : vector<2x4x256xf32>
    %c0_10 = arith.constant 0 : index
    %c0_11 = arith.constant 0 : index
    %c0_12 = arith.constant 0 : index
    %28 = vector.load %arg2[%c0_10, %c0_11, %c0_12] : memref<2x4x256xf32, #tpu.memory_space<vmem>>, vector<2x4x256xf32>
    tpu.vector_store %arg2[%c0_10, %c0_11, %c0_12], %27 {strides = array<i32>} : memref<2x4x256xf32, #tpu.memory_space<vmem>>, vector<2x4x256xf32>,
    %29 = vector.shape_cast %14 : vector<1x4x1xf32> to vector<4x1xf32>
    %30 = vector.shape_cast %29 : vector<4x1xf32> to vector<4x1xf32>
    %31 = vector.broadcast %30 : vector<4x1xf32> to vector<4x128xf32>
    %c0_13 = arith.constant 0 : index
    %c0_14 = arith.constant 0 : index
    %32 = vector.load %arg3[%c0_13, %c0_14] : memref<4x128xf32, #tpu.memory_space<vmem>>, vector<4x128xf32>
    tpu.vector_store %arg3[%c0_13, %c0_14], %31 {strides = array<i32>} : memref<4x128xf32, #tpu.memory_space<vmem>>, vector<4x128xf32>,
    %33 = vector.shape_cast %20 : vector<1x4x1xf32> to vector<4x1xf32>
    %34 = vector.shape_cast %33 : vector<4x1xf32> to vector<4x1xf32>
    %35 = vector.broadcast %34 : vector<4x1xf32> to vector<4x128xf32>
    %c0_15 = arith.constant 0 : index
    %c0_16 = arith.constant 0 : index
    %36 = vector.load %arg4[%c0_15, %c0_16] : memref<4x128xf32, #tpu.memory_space<vmem>>, vector<4x128xf32>
    tpu.vector_store %arg4[%c0_15, %c0_16], %35 {strides = array<i32>} : memref<4x128xf32, #tpu.memory_space<vmem>>, vector<4x128xf32>,
    return
  }
  func.func @transform_0(%arg0: i32) -> (i32, i32, i32) {
    %c0_i32 = arith.constant 0 : i32
    %c0_i32_0 = arith.constant 0 : i32
    %c0_i32_1 = arith.constant 0 : i32
    return %c0_i32, %arg0, %c0_i32_0 : i32, i32, i32
  }
  func.func @transform_1(%arg0: i32) -> (i32, i32, i32) {
    %c0_i32 = arith.constant 0 : i32
    %c0_i32_0 = arith.constant 0 : i32
    %c0_i32_1 = arith.constant 0 : i32
    return %c0_i32, %arg0, %c0_i32_0 : i32, i32, i32
  }
  func.func @transform_2(%arg0: i32) -> (i32, i32) {
    %c0_i32 = arith.constant 0 : i32
    %c0_i32_0 = arith.constant 0 : i32
    return %arg0, %c0_i32 : i32, i32
  }
  func.func @transform_3(%arg0: i32) -> (i32, i32) {
    %c0_i32 = arith.constant 0 : i32
    %c0_i32_0 = arith.constant 0 : i32
    return %arg0, %c0_i32 : i32, i32
  }
}

</mosaic_0001>

<bundles_post_ra>
// kernel: tpu_custom_call.1
= control target key start
LH: loop header
LB: loop body
LE: loop exit
PB: predicated region body
PF: predicated region fallthrough
CT: control target
= control target key end

     0   :  { %9 = vsyncpa [#allocation3], 0  ;;  %s357_s0 = inlined_call_operand.hbm [shape: f32[2,4,256], index: 0, kind: input, shape index: {}]   ;;  %s358_s1 = inlined_call_operand.hbm [shape: f32[2,4,256], index: 1, kind: output, shape index: {0}]   ;;  %s359_s2 = inlined_call_operand.hbm [shape: f32[4,128], index: 2, kind: output, shape index: {1}]   ;;  %s360_s3 = inlined_call_operand.hbm [shape: f32[4,128], index: 3, kind: output, shape index: {2}]  }
   0x1   :  { %10 = vsyncpa [#allocation4], 0 }
   0x2   :  { %11 = vsyncpa [#allocation7], 0  ;;  %s252_s12 = smov [#allocation2]   ;;  %s158_s16 = scalar_lea.hbm %s357_s0, 256 }
   0x3   :  { %s17_s13 = sshll.u32 %s252_s12, 4  ;;  %p159_p0 = scmp.ne.s32.totalorder %s357_s0, %s158_s16  ;;  %s18_s13 = int_to_ptr.vmem [resolvable:$true] %s17_s13 }
   0x4   :  { %p162_p1 = scmp.lt.u32.totalorder %s158_s16, %s357_s0 }
   0x6   :  { %p164_p2 = pnand %p162_p1, %p159_p0 }
   0x8   :  { %167 = shalt.err (!%p164_p2)
}
   0x9   :  { %s168_s21 = scalar_lea.vmem %s18_s13, 256  ;;  %p173_p4 = scmp.lt.s32.totalorder %s18_s13, %s18_s13 }
   0xa   :  { %p169_p3 = scmp.ne.s32.totalorder %s18_s13, %s168_s21  ;;  %p174_p5 = scmp.lt.s32.totalorder %s168_s21, %s168_s21 }
   0xc   :  { %p175_p6 = por %p174_p5, %p173_p4 }
   0xe   :  { %p176_p7 = pnand %p175_p6, %p169_p3 }
  0x10   :  { %179 = shalt.err (!%p176_p7)
}
  0x11   :  { %s253_s22 = smov 128   ;;  %s254_s23 = smov 8  }
  0x12   :  { %23 = dma.hbm_to_vmem [thread:$0]  %s357_s0, 256, %s18_s13, [#allocation3], %s253_s22, %s253_s22, %s254_s23  }
  0x13   :  { %246 = dma.done.wait [#allocation3], 256  }
  0x14   :  { %247 = vsyncadd [#allocation3], 4294967040  ;;  %v27_v0 = vld [vmem:[#allocation2] sm:$0xff]  ;;  %v28_v1 = vld [vmem:[#allocation2 + $0x8] sm:$0xff]  ;;  %vm43_vm0 = vcmask 1043456   ;;  %s255_s0 = smov [#allocation6]  }
  0x15   :  { %v29_v2 = vmul.f32 32.0, %v27_v0  ;;  %v30_v3 = vmul.f32 32.0, %v28_v1  ;;  %s121_s26 = sshll.u32 %s255_s0, 4  ;;  %s122_s26 = int_to_ptr.vmem [resolvable:$true] %s121_s26 }
  0x16   :  { %s180_s27 = scalar_lea.vmem %s122_s26, 64  ;;  %p185_p9 = scmp.lt.s32.totalorder %s122_s26, %s122_s26 }
  0x17   :  { %v147_v4 = vround.rtne.f32 %v29_v2  ;;  %v148_v5 = vround.rtne.f32 %v30_v3  ;;  %p181_p8 = scmp.ne.s32.totalorder %s122_s26, %s180_s27  ;;  %p186_p10 = scmp.lt.s32.totalorder %s180_s27, %s180_s27 }
  0x19   :  { %v33_v6 = vmax.f32 %v147_v4, -128.0  ;;  %v34_v7 = vmax.f32 %v148_v5, -128.0  ;;  %p187_p11 = por %p186_p10, %p185_p9 }
  0x1b   :  { %v294_v8 = vmin.f32 %v33_v6, 127.0  ;;  %v296_v9 = vmin.f32 %v34_v7, 127.0  ;;  %p188_p12 = pnand %p187_p11, %p181_p8 }
  0x1d   :  { %v39_v10 = vcombine.high %v294_v8, %v294_v8  ;;  %v40_v11 = vcombine.high %v296_v9, %v296_v9  ;;  %v44_v12 = vsel %vm43_vm0, %v294_v8, 0.0  ;;  %v53_v13 = vmul.f32 %v294_v8, %v294_v8 }
  0x1e   :  { %v54_v14 = vmul.f32 %v296_v9, %v296_v9  ;;  %v47_v16 = vsel %vm43_vm0, %v296_v9, 0.0 }
  0x1f   :  { %v45_v15 = vsel %vm43_vm0, %v39_v10, 0.0  ;;  %v57_v18 = vcombine.high %v53_v13, %v53_v13  ;;  %v61_v20 = vsel %vm43_vm0, %v53_v13, 0.0  ;;  %v49_v21 = vsel %vm43_vm0, %v40_v11, 0.0 }
  0x20   :  { %v46_v17 = vadd.f32 %v45_v15, %v44_v12  ;;  %v58_v19 = vcombine.high %v54_v14, %v54_v14  ;;  %v64_v24 = vsel %vm43_vm0, %v54_v14, 0.0 }
  0x21   :  { %v62_v23 = vsel %vm43_vm0, %v57_v18, 0.0 }
  0x22   :  { %v48_v22 = vadd.f32 %v47_v16, %v46_v17  ;;  %v63_v25 = vadd.f32 %v62_v23, %v61_v20  ;;  %v66_v27 = vsel %vm43_vm0, %v58_v19, 0.0 }
  0x24   :  { %v50_v26 = vadd.f32 %v49_v21, %v48_v22  ;;  %v65_v28 = vadd.f32 %v64_v24, %v63_v25 }
  0x26   :  { %51 = vadd.xlane.f32.xlu0 %v50_v26  ;;  %v67_v29 = vadd.f32 %v66_v27, %v65_v28 }
  0x2a   :  { %68 = vadd.xlane.f32.xlu0 %v67_v29 }
  0xb3   :  { %v52_v30 = vpop.xlane.xlu0 %51 }
  0xb4   :  { %v70_v31 = vmul.f32 0.001953125, %v52_v30 }
  0xb6   :  { %101 = vst [vmem:[#allocation6] sm:$0xf] %v70_v31 }
  0xb7   :  { %v69_v32 = vpop.xlane.xlu0 %68 }
  0xb8   :  { %191 = shalt.err (!%p188_p12)
}
  0xb9   :  { %s192_s30 = scalar_lea.hbm %s359_s2, 64 }
  0xba   :  { %p193_p13 = scmp.ne.s32.totalorder %s359_s2, %s192_s30  ;;  %p196_p0 = scmp.lt.u32.totalorder %s192_s30, %s359_s2 }
  0xbc   :  { %p198_p1 = pnand %p196_p0, %p193_p13 }
  0xbe   :  { %201 = shalt.err (!%p198_p1)
}
  0xbf   :  { %124 = dma.vmem_to_hbm [thread:$0]  %s122_s26, 64, %s359_s2, [#allocation7]   ;;  %v72_v33 = vmul.f32 %v70_v31, %v70_v31  ;;  %v71_v34 = vmul.f32 0.001953125, %v69_v32  ;;  %v257_v36 = vmov 839922192   ;;  %v79_v38 = vlaneseq }
  0xc0   :  { %s256_s10 = smov [#allocation8]   ;;  %v77_v37 = vunpack.c.l.s4 %v257_v36 }
  0xc1   :  { %s131_s11 = sshll.u32 %s256_s10, 4  ;;  %v73_v35 = vsub.f32 %v71_v34, %v72_v33  ;;  %v80_v42 = vshrl.u32 %v79_v38, 7  ;;  %s132_s11 = int_to_ptr.vmem [resolvable:$true] %s131_s11 }
  0xc2   :  { %v78_v41 = vunpack.c.0.s8 %v77_v37  ;;  %s202_s12 = scalar_lea.vmem %s132_s11, 64  ;;  %p207_p3 = scmp.lt.s32.totalorder %s132_s11, %s132_s11 }
  0xc3   :  { %v74_v39 = vmax.f32 %v73_v35, 0.0  ;;  %p203_p2 = scmp.ne.s32.totalorder %s132_s11, %s202_s12  ;;  %p208_p4 = scmp.lt.s32.totalorder %s202_s12, %s202_s12 }
  0xc5   :  { %v86_v40 = vadd.f32 0.01024, %v74_v39  ;;  %102 = vst [vmem:[#allocation8] sm:$0xf] %v74_v39  ;;  %p209_p5 = por %p208_p4, %p207_p3 }
  0xc7   :  { %p210_p6 = pnand %p209_p5, %p203_p2 }
  0xc9   :  { %213 = shalt.err (!%p210_p6)
}
  0xca   :  { %s214_s14 = scalar_lea.hbm %s360_s3, 64 }
  0xcb   :  { %p215_p7 = scmp.ne.s32.totalorder %s360_s3, %s214_s14  ;;  %p218_p8 = scmp.lt.u32.totalorder %s214_s14, %s360_s3 }
  0xcd   :  { %p220_p9 = pnand %p218_p8, %p215_p7 }
  0xcf   :  { %223 = shalt.err (!%p220_p9)
}
  0xd0   :  { %134 = dma.vmem_to_hbm [thread:$0]  %s132_s11, 64, %s360_s3, [#allocation7]   ;;  %156 = vrsqrt.f32 %v86_v40  ;;  %v81_v43 = vsub.s32 %v78_v41, %v80_v42 }
  0xd1   :  { %s258_s21 = smov [#allocation5]  }
  0xd2   :  { %v82_v44 = vrot.slane %v70_v31, %v81_v43  ;;  %s108_s24 = sshll.u32 %s258_s21, 4  ;;  %s109_s24 = int_to_ptr.vmem [resolvable:$true] %s108_s24 }
  0xd3   :  { %s224_s25 = scalar_lea.vmem %s109_s24, 256  ;;  %p229_p11 = scmp.lt.s32.totalorder %s109_s24, %s109_s24 }
  0xd4   :  { %v84_v46 = vsub.f32 %v294_v8, %v82_v44  ;;  %v85_v47 = vsub.f32 %v296_v9, %v82_v44  ;;  %p225_p10 = scmp.ne.s32.totalorder %s109_s24, %s224_s25  ;;  %p230_p12 = scmp.lt.s32.totalorder %s224_s25, %s224_s25 }
  0xd6   :  { %p231_p13 = por %p230_p12, %p229_p11 }
  0xd8   :  { %p232_p0 = pnand %p231_p13, %p225_p10 }
  0xda   :  { %v157_v45 = vpop.eup %156 }
  0xdb   :  { %v95_v48 = vrot.slane %v157_v45, %v81_v43 }
  0xdd   :  { %v97_v49 = vmul.f32 %v95_v48, %v84_v46  ;;  %v98_v50 = vmul.f32 %v95_v48, %v85_v47 }
  0xdf   :  { %99 = vst [vmem:[#allocation5] sm:$0xff] %v97_v49  ;;  %100 = vst [vmem:[#allocation5 + $0x8] sm:$0xff] %v98_v50 }
  0xe0   :  { %235 = shalt.err (!%p232_p0)
}
  0xe1   :  { %s236_s26 = scalar_lea.hbm %s358_s1, 256 }
  0xe2   :  { %p237_p1 = scmp.ne.s32.totalorder %s358_s1, %s236_s26  ;;  %p240_p2 = scmp.lt.u32.totalorder %s236_s26, %s358_s1 }
  0xe4   :  { %p242_p3 = pnand %p240_p2, %p237_p1 }
  0xe6   :  { %245 = shalt.err (!%p242_p3)
}
  0xe7   :  { %114 = dma.vmem_to_hbm [thread:$0]  %s109_s24, 256, %s358_s1, [#allocation4], %s253_s22, %s253_s22, %s254_s23  }
  0xe8   :  { %248 = dma.done.wait [#allocation4], 256  }
  0xe9   :  { %249 = vsyncadd [#allocation4], 4294967040 }
  0xea   :  { %250 = dma.done.wait [#allocation7], 128  }
  0xeb   :  { %251 = vsyncadd [#allocation7], 4294967168 }
  0xec   :  { %144 = vsyncpa [#allocation3], 1 }
  0xed   :  { %145 = vsyncpa [#allocation4], 1 }
  0xee   :  { %146 = vsyncpa [#allocation7], 1 }

</bundles_post_ra>
